<compile_context>
chip_gen: v6e
topology: v6e:2x2x1
jax: 0.10.0
libtpu: 0.0.40
codegen_flags: <defaults>
</compile_context>

<pallas_src>
import functools

import numpy as np
import jax
import jax.numpy as jnp
from jax import lax
from jax.experimental import pallas as pl
from jax.experimental.pallas import tpu as pltpu


def value_crop(d, mmin, mmax):
    return max(mmin, min(mmax, d))


def expands_rate(d, config):
    # Deterministic version of RF-Next's expands_rate:
    # candidate dilations {d-1, d, d+1} clipped to [mmin, mmax].
    return [
        value_crop(d - 1, config["mmin"], config["mmax"]),
        value_crop(d, config["mmin"], config["mmax"]),
        value_crop(d + 1, config["mmin"], config["mmax"]),
    ]


def conv1dop_kernel(scale_ref, x_ref, w_ref, o_ref, *,
                    rates, r_max, l_tile, n_l, K, C_in, b_tile):
    """Direct (VPU) dilated conv over one (batch-tile, L-tile) block.

    scale_ref : SMEM (n,)                     normalized branch weights
    x_ref     : VMEM (b_tile, C_in, lp)       input rows, halo-padded by r_max
    w_ref     : VMEM (C_out_p, K*C_in + 1)    [tap-major flattened weight | bias]
    o_ref     : VMEM (b_tile, C_out_p, l_tile)
    """
    n = len(rates)
    ctr = K // 2                                    # centre tap (K == 3 -> 1)

    # Hoisted once per grid step: JAX does not CSE broadcast_in_dim, and the
    # weight columns / scales are reused for every batch element and branch.
    w = w_ref[...]                                               # (C_out_p, K*C_in+1)
    wcol = [[w[:, k * C_in + c:k * C_in + c + 1] for c in range(C_in)]
            for k in range(K)]                                   # (C_out_p, 1) each
    bias = w[:, K * C_in:K * C_in + 1]                           # (C_out_p, 1)
    scales = [scale_ref[i] for i in range(n)]                    # SMEM scalars

    if n_l == 1:
        def tap(b, c, off):                                      # static lane window
            return x_ref[b, c:c + 1, off:off + l_tile]
    else:
        l0 = pl.multiple_of(pl.program_id(1) * l_tile, 128)

        def tap(b, c, off):                                      # dynamic lane window
            return x_ref[b, c:c + 1, pl.ds(l0 + off, l_tile)]

    for b in range(b_tile):
        # Centre tap + bias: identical for every rate (offset r_max), computed
        # once and shared by all branches (split is pre-ReLU, so it is exact).
        center = bias
        for c in range(C_in):
            center = center + wcol[ctr][c] * tap(b, c, r_max)    # (C_out_p, l_tile) f32

        acc = None
        for i, r in enumerate(rates):
            z = center
            for k in range(K):
                if k == ctr:
                    continue
                for c in range(C_in):
                    z = z + wcol[k][c] * tap(b, c, r_max + (k - ctr) * r)
            z = jnp.maximum(z, 0.0)                              # per-branch ReLU
            zi = z if n == 1 else scales[i] * z                  # single rate: no scale
            acc = zi if acc is None else acc + zi
        o_ref[b] = acc.astype(o_ref.dtype)


def conv1d_op_forward(x, conv_w, conv_b, alphas, rates, *, compute_dtype=None):
    """Pallas implementation of Conv1dOp.forward (stride=1, kernel size 3)."""
    B, C_in, L = x.shape
    C_out, C_in_w, K = conv_w.shape
    assert C_in_w == C_in
    # padding == dilation keeps the length only for K == 3 (the RF-Next case).
    assert K == 3, "Conv1dOp assumes kernel size 3 (padding == dilation)."
    n = len(rates)
    out_dtype = x.dtype
    if compute_dtype is None:
        # bf16 inputs halve HBM/DMA/VMEM traffic on v6e/v7x; weights and
        # accumulation stay f32 either way.  Default keeps the input dtype.
        compute_dtype = x.dtype

    # absavg normalization of the branch mixing weights (once, in f32).  The
    # tiny eps only guards the degenerate all-zero-alphas case against NaN.
    if n == 1:
        scales = jnp.ones((1,), jnp.float32)
    else:
        a = jnp.abs(alphas.astype(jnp.float32))
        scales = a / (jnp.sum(a) + jnp.finfo(jnp.float32).tiny)

    # Merge duplicate rates (expands_rate clipping can produce them): identical
    # branches, so their normalized weights simply add.
    uniq = []
    for r in rates:
        if r not in uniq:
            uniq.append(r)
    if len(uniq) != n:
        scales = jnp.stack([sum(scales[i] for i in range(n) if rates[i] == u)
                            for u in uniq])
        rates, n = uniq, len(uniq)
    rates = tuple(int(r) for r in rates)
    r_max = max(rates)

    # Lane/sublane-dense stores: pad the output length up to a lane multiple
    # and C_out up to a sublane multiple (both sliced off below).  The input
    # gets only the conv halo on top — no 128-rounding of the padded length.
    L_pad = ((L + 127) // 128) * 128
    C_out_p = ((C_out + 7) // 8) * 8
    lp = L_pad + 2 * r_max
    x_pad = jnp.pad(x, ((0, 0), (0, 0), (r_max, r_max + (L_pad - L))))
    x_pad = x_pad.astype(compute_dtype)

    # Weight re-layout: (C_out_p, K*C_in) with tap-major columns (matching the
    # in-kernel column order) plus the bias as one extra column; kept in f32 so
    # the VPU accumulation stays f32 even for bf16 inputs.
    w_flat = jnp.transpose(conv_w, (0, 2, 1)).reshape(C_out, K * C_in)
    w_aug = jnp.concatenate([w_flat, conv_b.reshape(C_out, 1)], axis=1)
    w_aug = jnp.pad(w_aug, ((0, C_out_p - C_out), (0, 0))).astype(jnp.float32)

    # ---- tiling -----------------------------------------------------------
    # L axis: a multiple-of-128 divisor of L_pad, output block <= ~256 KiB.
    units = L_pad // 128
    max_units = max(1, (256 * 1024) // (C_out_p * 4 * 128))
    lu = 1
    for t in range(1, units + 1):
        if units % t == 0 and t <= max_units:
            lu = t
    l_tile = 128 * lu
    n_l = L_pad // l_tile

    # Batch axis: largest divisor of B whose (input + output) block stays
    # within ~2 MiB (double-buffered blocks then fit every generation's scoped
    # VMEM, including v7x's 64 MiB physical) while keeping >= 2 (ideally 4)
    # grid steps so both v7x TensorCores get work.
    in_bytes = C_in * lp * np.dtype(compute_dtype).itemsize
    out_bytes = C_out_p * l_tile * np.dtype(out_dtype).itemsize
    budget = 2 * 1024 * 1024
    target_steps = 4 if B * n_l >= 4 else min(2, B * n_l)
    b_tile = 1
    for t in range(1, B + 1):
        if B % t or t * (in_bytes + out_bytes) > budget:
            continue
        if (B // t) * n_l >= target_steps:
            b_tile = t
    grid = (B // b_tile, n_l)

    kernel = functools.partial(
        conv1dop_kernel, rates=rates, r_max=r_max, l_tile=l_tile, n_l=n_l,
        K=K, C_in=C_in, b_tile=b_tile)

    out = pl.pallas_call(
        kernel,
        out_shape=jax.ShapeDtypeStruct((B, C_out_p, L_pad), out_dtype),
        grid=grid,
        in_specs=[
            pl.BlockSpec(memory_space=pltpu.MemorySpace.SMEM),             # scales
            pl.BlockSpec((b_tile, C_in, lp), lambda b, l: (b, 0, 0)),      # x (halo)
            pl.BlockSpec((C_out_p, K * C_in + 1), lambda b, l: (0, 0)),    # W | bias
        ],
        out_specs=pl.BlockSpec((b_tile, C_out_p, l_tile), lambda b, l: (b, 0, l)),
        compiler_params=pltpu.CompilerParams(
            dimension_semantics=("parallel", "parallel"),
            vmem_limit_bytes=32 * 1024 * 1024),
    )(scales, x_pad, w_aug)
    return out[:, :C_out, :L]


def reference_forward(x, conv_w, conv_b, alphas, rates):
    """Pure-JAX reference mirroring the PyTorch Conv1dOp.forward."""
    n = len(rates)
    if n > 1:
        a = jnp.abs(alphas)
        norm = a / jnp.sum(a)
    outs = []
    for i, r in enumerate(rates):
        o = lax.conv_general_dilated(
            x, conv_w, window_strides=(1,), padding=[(r, r)],
            rhs_dilation=(r,), dimension_numbers=("NCH", "OIH", "NCH"))
        o = jnp.maximum(o + conv_b[None, :, None], 0.0)
        if n > 1:
            o = o * norm[i]
        outs.append(o)
    res = outs[0]
    for i in range(1, n):
        res = res + outs[i]
    return res


if __name__ == "__main__":
    # Synthetic global_config / op_layer setup (Conv1d 4 -> 8, k=3, stride 1).
    global_config = {"normlize": "absavg", "init_alphas": 1.0,
                     "mmin": 1, "mmax": 8}
    init_dilation = 2
    rates = expands_rate(init_dilation, global_config)   # -> [1, 2, 3]

    B, C_in, C_out, L, K = 2, 4, 8, 128, 3

    key = jax.random.PRNGKey(0)
    kx, kw, kb, ka = jax.random.split(key, 4)
    x = jax.random.normal(kx, (B, C_in, L), dtype=jnp.float32)
    conv_w = 0.1 * jax.random.normal(kw, (C_out, C_in, K), dtype=jnp.float32)
    conv_b = 0.1 * jax.random.normal(kb, (C_out,), dtype=jnp.float32)
    # nn.init.constant_(alphas, init_alphas), plus a small perturbation so the
    # three branch weights are distinct (stronger correctness check).
    alphas = (global_config["init_alphas"]
              + 0.1 * jax.random.normal(ka, (len(rates),), dtype=jnp.float32))

    # Multi-rate path (the usual case).
    y = jax.block_until_ready(conv1d_op_forward(x, conv_w, conv_b, alphas, rates))
    y_ref = reference_forward(x, conv_w, conv_b, alphas, rates)
    assert y.shape == (B, C_out, L)
    assert jnp.allclose(y, y_ref, atol=1e-4, rtol=1e-4), (
        float(jnp.max(jnp.abs(y - y_ref))))

    # Single-rate path (len(rates) == 1: no mixing weight).
    y1 = jax.block_until_ready(
        conv1d_op_forward(x, conv_w, conv_b, alphas[:1], [2]))
    y1_ref = reference_forward(x, conv_w, conv_b, alphas[:1], [2])
    assert jnp.allclose(y1, y1_ref, atol=1e-4, rtol=1e-4)

    # bf16 input stream (v6e/v7x fast path), f32 accumulation.
    yb = jax.block_until_ready(
        conv1d_op_forward(x, conv_w, conv_b, alphas, rates,
                          compute_dtype=jnp.bfloat16))
    assert jnp.allclose(yb.astype(jnp.float32), y_ref, atol=5e-2, rtol=5e-2)

    # Ragged shapes: L not a lane multiple, C_out not a sublane multiple,
    # multi-step batch grid (exercises the padding / slicing path).
    B2, C_in2, C_out2, L2 = 4, 5, 6, 100
    kx2, kw2, kb2 = jax.random.split(jax.random.PRNGKey(1), 3)
    x2 = jax.random.normal(kx2, (B2, C_in2, L2), dtype=jnp.float32)
    w2 = 0.1 * jax.random.normal(kw2, (C_out2, C_in2, K), dtype=jnp.float32)
    b2 = 0.1 * jax.random.normal(kb2, (C_out2,), dtype=jnp.float32)
    y2 = jax.block_until_ready(conv1d_op_forward(x2, w2, b2, alphas, rates))
    y2_ref = reference_forward(x2, w2, b2, alphas, rates)
    assert y2.shape == (B2, C_out2, L2)
    assert jnp.allclose(y2, y2_ref, atol=1e-4, rtol=1e-4)

    print("KERNEL_OK")
</pallas_src>

<mosaic_0001>
module attributes {stable_mosaic.version = 11 : i64} {
  func.func @conv1dop_kernel(%arg0: i32, %arg1: i32, %arg2: memref<3xf32, #tpu.memory_space<smem>>, %arg3: memref<1x4x134xf32, #tpu.memory_space<vmem>>, %arg4: memref<8x13xf32, #tpu.memory_space<vmem>>, %arg5: memref<1x8x128xf32, #tpu.memory_space<vmem>>) attributes {dimension_semantics = [#tpu.dimension_semantics<parallel>, #tpu.dimension_semantics<parallel>], iteration_bounds = array<i64: 2, 1>, scalar_prefetch = 0 : i64, scratch_operands = 0 : i64, tpu.core_type = #tpu.core_type<tc>, window_params = [{transform_indices = @transform_0, window_bounds = array<i64: 3>}, {transform_indices = @transform_1, window_bounds = array<i64: 1, 4, 134>}, {pipeline_mode = #tpu.pipeline_mode<synchronous>, transform_indices = @transform_2, window_bounds = array<i64: 8, 13>}, {transform_indices = @transform_3, window_bounds = array<i64: 1, 8, 128>}]} {
    %c0 = arith.constant 0 : index
    %c0_0 = arith.constant 0 : index
    %0 = vector.load %arg4[%c0, %c0_0] : memref<8x13xf32, #tpu.memory_space<vmem>>, vector<8x13xf32>
    %1 = vector.extract_strided_slice %0 {offsets = [0, 0], sizes = [8, 1], strides = [1, 1]} : vector<8x13xf32> to vector<8x1xf32>
    %2 = vector.extract_strided_slice %0 {offsets = [0, 1], sizes = [8, 1], strides = [1, 1]} : vector<8x13xf32> to vector<8x1xf32>
    %3 = vector.extract_strided_slice %0 {offsets = [0, 2], sizes = [8, 1], strides = [1, 1]} : vector<8x13xf32> to vector<8x1xf32>
    %4 = vector.extract_strided_slice %0 {offsets = [0, 3], sizes = [8, 1], strides = [1, 1]} : vector<8x13xf32> to vector<8x1xf32>
    %5 = vector.extract_strided_slice %0 {offsets = [0, 4], sizes = [8, 1], strides = [1, 1]} : vector<8x13xf32> to vector<8x1xf32>
    %6 = vector.extract_strided_slice %0 {offsets = [0, 5], sizes = [8, 1], strides = [1, 1]} : vector<8x13xf32> to vector<8x1xf32>
    %7 = vector.extract_strided_slice %0 {offsets = [0, 6], sizes = [8, 1], strides = [1, 1]} : vector<8x13xf32> to vector<8x1xf32>
    %8 = vector.extract_strided_slice %0 {offsets = [0, 7], sizes = [8, 1], strides = [1, 1]} : vector<8x13xf32> to vector<8x1xf32>
    %9 = vector.extract_strided_slice %0 {offsets = [0, 8], sizes = [8, 1], strides = [1, 1]} : vector<8x13xf32> to vector<8x1xf32>
    %10 = vector.extract_strided_slice %0 {offsets = [0, 9], sizes = [8, 1], strides = [1, 1]} : vector<8x13xf32> to vector<8x1xf32>
    %11 = vector.extract_strided_slice %0 {offsets = [0, 10], sizes = [8, 1], strides = [1, 1]} : vector<8x13xf32> to vector<8x1xf32>
    %12 = vector.extract_strided_slice %0 {offsets = [0, 11], sizes = [8, 1], strides = [1, 1]} : vector<8x13xf32> to vector<8x1xf32>
    %13 = vector.extract_strided_slice %0 {offsets = [0, 12], sizes = [8, 1], strides = [1, 1]} : vector<8x13xf32> to vector<8x1xf32>
    %c0_1 = arith.constant 0 : index
    %14 = memref.load %arg2[%c0_1] : memref<3xf32, #tpu.memory_space<smem>>
    %c1 = arith.constant 1 : index
    %15 = memref.load %arg2[%c1] : memref<3xf32, #tpu.memory_space<smem>>
    %c2 = arith.constant 2 : index
    %16 = memref.load %arg2[%c2] : memref<3xf32, #tpu.memory_space<smem>>
    %c0_2 = arith.constant 0 : index
    %c0_3 = arith.constant 0 : index
    %c3 = arith.constant 3 : index
    %17 = vector.load %arg3[%c0_2, %c0_3, %c3] : memref<1x4x134xf32, #tpu.memory_space<vmem>>, vector<1x1x128xf32>
    %18 = vector.shape_cast %17 : vector<1x1x128xf32> to vector<1x128xf32>
    %19 = vector.broadcast %5 : vector<8x1xf32> to vector<8x128xf32>
    %20 = vector.broadcast %18 : vector<1x128xf32> to vector<8x128xf32>
    %21 = arith.mulf %19, %20 : vector<8x128xf32>
    %22 = vector.broadcast %13 : vector<8x1xf32> to vector<8x128xf32>
    %23 = arith.addf %22, %21 : vector<8x128xf32>
    %c0_4 = arith.constant 0 : index
    %c1_5 = arith.constant 1 : index
    %c3_6 = arith.constant 3 : index
    %24 = vector.load %arg3[%c0_4, %c1_5, %c3_6] : memref<1x4x134xf32, #tpu.memory_space<vmem>>, vector<1x1x128xf32>
    %25 = vector.shape_cast %24 : vector<1x1x128xf32> to vector<1x128xf32>
    %26 = vector.broadcast %6 : vector<8x1xf32> to vector<8x128xf32>
    %27 = vector.broadcast %25 : vector<1x128xf32> to vector<8x128xf32>
    %28 = arith.mulf %26, %27 : vector<8x128xf32>
    %29 = arith.addf %23, %28 : vector<8x128xf32>
    %c0_7 = arith.constant 0 : index
    %c2_8 = arith.constant 2 : index
    %c3_9 = arith.constant 3 : index
    %30 = vector.load %arg3[%c0_7, %c2_8, %c3_9] : memref<1x4x134xf32, #tpu.memory_space<vmem>>, vector<1x1x128xf32>
    %31 = vector.shape_cast %30 : vector<1x1x128xf32> to vector<1x128xf32>
    %32 = vector.broadcast %7 : vector<8x1xf32> to vector<8x128xf32>
    %33 = vector.broadcast %31 : vector<1x128xf32> to vector<8x128xf32>
    %34 = arith.mulf %32, %33 : vector<8x128xf32>
    %35 = arith.addf %29, %34 : vector<8x128xf32>
    %c0_10 = arith.constant 0 : index
    %c3_11 = arith.constant 3 : index
    %c3_12 = arith.constant 3 : index
    %36 = vector.load %arg3[%c0_10, %c3_11, %c3_12] : memref<1x4x134xf32, #tpu.memory_space<vmem>>, vector<1x1x128xf32>
    %37 = vector.shape_cast %36 : vector<1x1x128xf32> to vector<1x128xf32>
    %38 = vector.broadcast %8 : vector<8x1xf32> to vector<8x128xf32>
    %39 = vector.broadcast %37 : vector<1x128xf32> to vector<8x128xf32>
    %40 = arith.mulf %38, %39 : vector<8x128xf32>
    %41 = arith.addf %35, %40 : vector<8x128xf32>
    %c0_13 = arith.constant 0 : index
    %c0_14 = arith.constant 0 : index
    %c2_15 = arith.constant 2 : index
    %42 = vector.load %arg3[%c0_13, %c0_14, %c2_15] : memref<1x4x134xf32, #tpu.memory_space<vmem>>, vector<1x1x128xf32>
    %43 = vector.shape_cast %42 : vector<1x1x128xf32> to vector<1x128xf32>
    %44 = vector.broadcast %1 : vector<8x1xf32> to vector<8x128xf32>
    %45 = vector.broadcast %43 : vector<1x128xf32> to vector<8x128xf32>
    %46 = arith.mulf %44, %45 : vector<8x128xf32>
    %47 = arith.addf %41, %46 : vector<8x128xf32>
    %c0_16 = arith.constant 0 : index
    %c1_17 = arith.constant 1 : index
    %c2_18 = arith.constant 2 : index
    %48 = vector.load %arg3[%c0_16, %c1_17, %c2_18] : memref<1x4x134xf32, #tpu.memory_space<vmem>>, vector<1x1x128xf32>
    %49 = vector.shape_cast %48 : vector<1x1x128xf32> to vector<1x128xf32>
    %50 = vector.broadcast %2 : vector<8x1xf32> to vector<8x128xf32>
    %51 = vector.broadcast %49 : vector<1x128xf32> to vector<8x128xf32>
    %52 = arith.mulf %50, %51 : vector<8x128xf32>
    %53 = arith.addf %47, %52 : vector<8x128xf32>
    %c0_19 = arith.constant 0 : index
    %c2_20 = arith.constant 2 : index
    %c2_21 = arith.constant 2 : index
    %54 = vector.load %arg3[%c0_19, %c2_20, %c2_21] : memref<1x4x134xf32, #tpu.memory_space<vmem>>, vector<1x1x128xf32>
    %55 = vector.shape_cast %54 : vector<1x1x128xf32> to vector<1x128xf32>
    %56 = vector.broadcast %3 : vector<8x1xf32> to vector<8x128xf32>
    %57 = vector.broadcast %55 : vector<1x128xf32> to vector<8x128xf32>
    %58 = arith.mulf %56, %57 : vector<8x128xf32>
    %59 = arith.addf %53, %58 : vector<8x128xf32>
    %c0_22 = arith.constant 0 : index
    %c3_23 = arith.constant 3 : index
    %c2_24 = arith.constant 2 : index
    %60 = vector.load %arg3[%c0_22, %c3_23, %c2_24] : memref<1x4x134xf32, #tpu.memory_space<vmem>>, vector<1x1x128xf32>
    %61 = vector.shape_cast %60 : vector<1x1x128xf32> to vector<1x128xf32>
    %62 = vector.broadcast %4 : vector<8x1xf32> to vector<8x128xf32>
    %63 = vector.broadcast %61 : vector<1x128xf32> to vector<8x128xf32>
    %64 = arith.mulf %62, %63 : vector<8x128xf32>
    %65 = arith.addf %59, %64 : vector<8x128xf32>
    %c0_25 = arith.constant 0 : index
    %c0_26 = arith.constant 0 : index
    %c4 = arith.constant 4 : index
    %66 = vector.load %arg3[%c0_25, %c0_26, %c4] : memref<1x4x134xf32, #tpu.memory_space<vmem>>, vector<1x1x128xf32>
    %67 = vector.shape_cast %66 : vector<1x1x128xf32> to vector<1x128xf32>
    %68 = vector.broadcast %9 : vector<8x1xf32> to vector<8x128xf32>
    %69 = vector.broadcast %67 : vector<1x128xf32> to vector<8x128xf32>
    %70 = arith.mulf %68, %69 : vector<8x128xf32>
    %71 = arith.addf %65, %70 : vector<8x128xf32>
    %c0_27 = arith.constant 0 : index
    %c1_28 = arith.constant 1 : index
    %c4_29 = arith.constant 4 : index
    %72 = vector.load %arg3[%c0_27, %c1_28, %c4_29] : memref<1x4x134xf32, #tpu.memory_space<vmem>>, vector<1x1x128xf32>
    %73 = vector.shape_cast %72 : vector<1x1x128xf32> to vector<1x128xf32>
    %74 = vector.broadcast %10 : vector<8x1xf32> to vector<8x128xf32>
    %75 = vector.broadcast %73 : vector<1x128xf32> to vector<8x128xf32>
    %76 = arith.mulf %74, %75 : vector<8x128xf32>
    %77 = arith.addf %71, %76 : vector<8x128xf32>
    %c0_30 = arith.constant 0 : index
    %c2_31 = arith.constant 2 : index
    %c4_32 = arith.constant 4 : index
    %78 = vector.load %arg3[%c0_30, %c2_31, %c4_32] : memref<1x4x134xf32, #tpu.memory_space<vmem>>, vector<1x1x128xf32>
    %79 = vector.shape_cast %78 : vector<1x1x128xf32> to vector<1x128xf32>
    %80 = vector.broadcast %11 : vector<8x1xf32> to vector<8x128xf32>
    %81 = vector.broadcast %79 : vector<1x128xf32> to vector<8x128xf32>
    %82 = arith.mulf %80, %81 : vector<8x128xf32>
    %83 = arith.addf %77, %82 : vector<8x128xf32>
    %c0_33 = arith.constant 0 : index
    %c3_34 = arith.constant 3 : index
    %c4_35 = arith.constant 4 : index
    %84 = vector.load %arg3[%c0_33, %c3_34, %c4_35] : memref<1x4x134xf32, #tpu.memory_space<vmem>>, vector<1x1x128xf32>
    %85 = vector.shape_cast %84 : vector<1x1x128xf32> to vector<1x128xf32>
    %86 = vector.broadcast %12 : vector<8x1xf32> to vector<8x128xf32>
    %87 = vector.broadcast %85 : vector<1x128xf32> to vector<8x128xf32>
    %88 = arith.mulf %86, %87 : vector<8x128xf32>
    %89 = arith.addf %83, %88 : vector<8x128xf32>
    %cst = arith.constant 0.000000e+00 : f32
    %90 = vector.broadcast %cst : f32 to vector<8x128xf32>
    %91 = arith.maximumf %89, %90 : vector<8x128xf32>
    %92 = vector.broadcast %14 : f32 to vector<8x128xf32>
    %93 = arith.mulf %92, %91 : vector<8x128xf32>
    %c0_36 = arith.constant 0 : index
    %c0_37 = arith.constant 0 : index
    %c1_38 = arith.constant 1 : index
    %94 = vector.load %arg3[%c0_36, %c0_37, %c1_38] : memref<1x4x134xf32, #tpu.memory_space<vmem>>, vector<1x1x128xf32>
    %95 = vector.shape_cast %94 : vector<1x1x128xf32> to vector<1x128xf32>
    %96 = vector.broadcast %1 : vector<8x1xf32> to vector<8x128xf32>
    %97 = vector.broadcast %95 : vector<1x128xf32> to vector<8x128xf32>
    %98 = arith.mulf %96, %97 : vector<8x128xf32>
    %99 = arith.addf %41, %98 : vector<8x128xf32>
    %c0_39 = arith.constant 0 : index
    %c1_40 = arith.constant 1 : index
    %c1_41 = arith.constant 1 : index
    %100 = vector.load %arg3[%c0_39, %c1_40, %c1_41] : memref<1x4x134xf32, #tpu.memory_space<vmem>>, vector<1x1x128xf32>
    %101 = vector.shape_cast %100 : vector<1x1x128xf32> to vector<1x128xf32>
    %102 = vector.broadcast %2 : vector<8x1xf32> to vector<8x128xf32>
    %103 = vector.broadcast %101 : vector<1x128xf32> to vector<8x128xf32>
    %104 = arith.mulf %102, %103 : vector<8x128xf32>
    %105 = arith.addf %99, %104 : vector<8x128xf32>
    %c0_42 = arith.constant 0 : index
    %c2_43 = arith.constant 2 : index
    %c1_44 = arith.constant 1 : index
    %106 = vector.load %arg3[%c0_42, %c2_43, %c1_44] : memref<1x4x134xf32, #tpu.memory_space<vmem>>, vector<1x1x128xf32>
    %107 = vector.shape_cast %106 : vector<1x1x128xf32> to vector<1x128xf32>
    %108 = vector.broadcast %3 : vector<8x1xf32> to vector<8x128xf32>
    %109 = vector.broadcast %107 : vector<1x128xf32> to vector<8x128xf32>
    %110 = arith.mulf %108, %109 : vector<8x128xf32>
    %111 = arith.addf %105, %110 : vector<8x128xf32>
    %c0_45 = arith.constant 0 : index
    %c3_46 = arith.constant 3 : index
    %c1_47 = arith.constant 1 : index
    %112 = vector.load %arg3[%c0_45, %c3_46, %c1_47] : memref<1x4x134xf32, #tpu.memory_space<vmem>>, vector<1x1x128xf32>
    %113 = vector.shape_cast %112 : vector<1x1x128xf32> to vector<1x128xf32>
    %114 = vector.broadcast %4 : vector<8x1xf32> to vector<8x128xf32>
    %115 = vector.broadcast %113 : vector<1x128xf32> to vector<8x128xf32>
    %116 = arith.mulf %114, %115 : vector<8x128xf32>
    %117 = arith.addf %111, %116 : vector<8x128xf32>
    %c0_48 = arith.constant 0 : index
    %c0_49 = arith.constant 0 : index
    %c5 = arith.constant 5 : index
    %118 = vector.load %arg3[%c0_48, %c0_49, %c5] : memref<1x4x134xf32, #tpu.memory_space<vmem>>, vector<1x1x128xf32>
    %119 = vector.shape_cast %118 : vector<1x1x128xf32> to vector<1x128xf32>
    %120 = vector.broadcast %9 : vector<8x1xf32> to vector<8x128xf32>
    %121 = vector.broadcast %119 : vector<1x128xf32> to vector<8x128xf32>
    %122 = arith.mulf %120, %121 : vector<8x128xf32>
    %123 = arith.addf %117, %122 : vector<8x128xf32>
    %c0_50 = arith.constant 0 : index
    %c1_51 = arith.constant 1 : index
    %c5_52 = arith.constant 5 : index
    %124 = vector.load %arg3[%c0_50, %c1_51, %c5_52] : memref<1x4x134xf32, #tpu.memory_space<vmem>>, vector<1x1x128xf32>
    %125 = vector.shape_cast %124 : vector<1x1x128xf32> to vector<1x128xf32>
    %126 = vector.broadcast %10 : vector<8x1xf32> to vector<8x128xf32>
    %127 = vector.broadcast %125 : vector<1x128xf32> to vector<8x128xf32>
    %128 = arith.mulf %126, %127 : vector<8x128xf32>
    %129 = arith.addf %123, %128 : vector<8x128xf32>
    %c0_53 = arith.constant 0 : index
    %c2_54 = arith.constant 2 : index
    %c5_55 = arith.constant 5 : index
    %130 = vector.load %arg3[%c0_53, %c2_54, %c5_55] : memref<1x4x134xf32, #tpu.memory_space<vmem>>, vector<1x1x128xf32>
    %131 = vector.shape_cast %130 : vector<1x1x128xf32> to vector<1x128xf32>
    %132 = vector.broadcast %11 : vector<8x1xf32> to vector<8x128xf32>
    %133 = vector.broadcast %131 : vector<1x128xf32> to vector<8x128xf32>
    %134 = arith.mulf %132, %133 : vector<8x128xf32>
    %135 = arith.addf %129, %134 : vector<8x128xf32>
    %c0_56 = arith.constant 0 : index
    %c3_57 = arith.constant 3 : index
    %c5_58 = arith.constant 5 : index
    %136 = vector.load %arg3[%c0_56, %c3_57, %c5_58] : memref<1x4x134xf32, #tpu.memory_space<vmem>>, vector<1x1x128xf32>
    %137 = vector.shape_cast %136 : vector<1x1x128xf32> to vector<1x128xf32>
    %138 = vector.broadcast %12 : vector<8x1xf32> to vector<8x128xf32>
    %139 = vector.broadcast %137 : vector<1x128xf32> to vector<8x128xf32>
    %140 = arith.mulf %138, %139 : vector<8x128xf32>
    %141 = arith.addf %135, %140 : vector<8x128xf32>
    %cst_59 = arith.constant 0.000000e+00 : f32
    %142 = vector.broadcast %cst_59 : f32 to vector<8x128xf32>
    %143 = arith.maximumf %141, %142 : vector<8x128xf32>
    %144 = vector.broadcast %15 : f32 to vector<8x128xf32>
    %145 = arith.mulf %144, %143 : vector<8x128xf32>
    %146 = arith.addf %93, %145 : vector<8x128xf32>
    %c0_60 = arith.constant 0 : index
    %c0_61 = arith.constant 0 : index
    %c0_62 = arith.constant 0 : index
    %147 = vector.load %arg3[%c0_60, %c0_61, %c0_62] : memref<1x4x134xf32, #tpu.memory_space<vmem>>, vector<1x1x128xf32>
    %148 = vector.shape_cast %147 : vector<1x1x128xf32> to vector<1x128xf32>
    %149 = vector.broadcast %1 : vector<8x1xf32> to vector<8x128xf32>
    %150 = vector.broadcast %148 : vector<1x128xf32> to vector<8x128xf32>
    %151 = arith.mulf %149, %150 : vector<8x128xf32>
    %152 = arith.addf %41, %151 : vector<8x128xf32>
    %c0_63 = arith.constant 0 : index
    %c1_64 = arith.constant 1 : index
    %c0_65 = arith.constant 0 : index
    %153 = vector.load %arg3[%c0_63, %c1_64, %c0_65] : memref<1x4x134xf32, #tpu.memory_space<vmem>>, vector<1x1x128xf32>
    %154 = vector.shape_cast %153 : vector<1x1x128xf32> to vector<1x128xf32>
    %155 = vector.broadcast %2 : vector<8x1xf32> to vector<8x128xf32>
    %156 = vector.broadcast %154 : vector<1x128xf32> to vector<8x128xf32>
    %157 = arith.mulf %155, %156 : vector<8x128xf32>
    %158 = arith.addf %152, %157 : vector<8x128xf32>
    %c0_66 = arith.constant 0 : index
    %c2_67 = arith.constant 2 : index
    %c0_68 = arith.constant 0 : index
    %159 = vector.load %arg3[%c0_66, %c2_67, %c0_68] : memref<1x4x134xf32, #tpu.memory_space<vmem>>, vector<1x1x128xf32>
    %160 = vector.shape_cast %159 : vector<1x1x128xf32> to vector<1x128xf32>
    %161 = vector.broadcast %3 : vector<8x1xf32> to vector<8x128xf32>
    %162 = vector.broadcast %160 : vector<1x128xf32> to vector<8x128xf32>
    %163 = arith.mulf %161, %162 : vector<8x128xf32>
    %164 = arith.addf %158, %163 : vector<8x128xf32>
    %c0_69 = arith.constant 0 : index
    %c3_70 = arith.constant 3 : index
    %c0_71 = arith.constant 0 : index
    %165 = vector.load %arg3[%c0_69, %c3_70, %c0_71] : memref<1x4x134xf32, #tpu.memory_space<vmem>>, vector<1x1x128xf32>
    %166 = vector.shape_cast %165 : vector<1x1x128xf32> to vector<1x128xf32>
    %167 = vector.broadcast %4 : vector<8x1xf32> to vector<8x128xf32>
    %168 = vector.broadcast %166 : vector<1x128xf32> to vector<8x128xf32>
    %169 = arith.mulf %167, %168 : vector<8x128xf32>
    %170 = arith.addf %164, %169 : vector<8x128xf32>
    %c0_72 = arith.constant 0 : index
    %c0_73 = arith.constant 0 : index
    %c6 = arith.constant 6 : index
    %171 = vector.load %arg3[%c0_72, %c0_73, %c6] : memref<1x4x134xf32, #tpu.memory_space<vmem>>, vector<1x1x128xf32>
    %172 = vector.shape_cast %171 : vector<1x1x128xf32> to vector<1x128xf32>
    %173 = vector.broadcast %9 : vector<8x1xf32> to vector<8x128xf32>
    %174 = vector.broadcast %172 : vector<1x128xf32> to vector<8x128xf32>
    %175 = arith.mulf %173, %174 : vector<8x128xf32>
    %176 = arith.addf %170, %175 : vector<8x128xf32>
    %c0_74 = arith.constant 0 : index
    %c1_75 = arith.constant 1 : index
    %c6_76 = arith.constant 6 : index
    %177 = vector.load %arg3[%c0_74, %c1_75, %c6_76] : memref<1x4x134xf32, #tpu.memory_space<vmem>>, vector<1x1x128xf32>
    %178 = vector.shape_cast %177 : vector<1x1x128xf32> to vector<1x128xf32>
    %179 = vector.broadcast %10 : vector<8x1xf32> to vector<8x128xf32>
    %180 = vector.broadcast %178 : vector<1x128xf32> to vector<8x128xf32>
    %181 = arith.mulf %179, %180 : vector<8x128xf32>
    %182 = arith.addf %176, %181 : vector<8x128xf32>
    %c0_77 = arith.constant 0 : index
    %c2_78 = arith.constant 2 : index
    %c6_79 = arith.constant 6 : index
    %183 = vector.load %arg3[%c0_77, %c2_78, %c6_79] : memref<1x4x134xf32, #tpu.memory_space<vmem>>, vector<1x1x128xf32>
    %184 = vector.shape_cast %183 : vector<1x1x128xf32> to vector<1x128xf32>
    %185 = vector.broadcast %11 : vector<8x1xf32> to vector<8x128xf32>
    %186 = vector.broadcast %184 : vector<1x128xf32> to vector<8x128xf32>
    %187 = arith.mulf %185, %186 : vector<8x128xf32>
    %188 = arith.addf %182, %187 : vector<8x128xf32>
    %c0_80 = arith.constant 0 : index
    %c3_81 = arith.constant 3 : index
    %c6_82 = arith.constant 6 : index
    %189 = vector.load %arg3[%c0_80, %c3_81, %c6_82] : memref<1x4x134xf32, #tpu.memory_space<vmem>>, vector<1x1x128xf32>
    %190 = vector.shape_cast %189 : vector<1x1x128xf32> to vector<1x128xf32>
    %191 = vector.broadcast %12 : vector<8x1xf32> to vector<8x128xf32>
    %192 = vector.broadcast %190 : vector<1x128xf32> to vector<8x128xf32>
    %193 = arith.mulf %191, %192 : vector<8x128xf32>
    %194 = arith.addf %188, %193 : vector<8x128xf32>
    %cst_83 = arith.constant 0.000000e+00 : f32
    %195 = vector.broadcast %cst_83 : f32 to vector<8x128xf32>
    %196 = arith.maximumf %194, %195 : vector<8x128xf32>
    %197 = vector.broadcast %16 : f32 to vector<8x128xf32>
    %198 = arith.mulf %197, %196 : vector<8x128xf32>
    %199 = arith.addf %146, %198 : vector<8x128xf32>
    %c0_84 = arith.constant 0 : index
    %c0_85 = arith.constant 0 : index
    %c0_86 = arith.constant 0 : index
    %200 = vector.load %arg5[%c0_84, %c0_85, %c0_86] : memref<1x8x128xf32, #tpu.memory_space<vmem>>, vector<1x8x128xf32>
    %201 = vector.shape_cast %200 : vector<1x8x128xf32> to vector<8x128xf32>
    %202 = vector.shape_cast %199 : vector<8x128xf32> to vector<1x8x128xf32>
    tpu.vector_store %arg5[%c0_84, %c0_85, %c0_86], %202 {strides = array<i32>} : memref<1x8x128xf32, #tpu.memory_space<vmem>>, vector<1x8x128xf32>,
    return
  }
  func.func @transform_0(%arg0: i32, %arg1: i32) -> i32 {
    %c0_i32 = arith.constant 0 : i32
    %c0_i32_0 = arith.constant 0 : i32
    return %c0_i32 : i32
  }
  func.func @transform_1(%arg0: i32, %arg1: i32) -> (i32, i32, i32) {
    %c0_i32 = arith.constant 0 : i32
    %c0_i32_0 = arith.constant 0 : i32
    %c0_i32_1 = arith.constant 0 : i32
    return %arg0, %c0_i32, %c0_i32_0 : i32, i32, i32
  }
  func.func @transform_2(%arg0: i32, %arg1: i32) -> (i32, i32) {
    %c0_i32 = arith.constant 0 : i32
    %c0_i32_0 = arith.constant 0 : i32
    %c0_i32_1 = arith.constant 0 : i32
    return %c0_i32, %c0_i32_0 : i32, i32
  }
  func.func @transform_3(%arg0: i32, %arg1: i32) -> (i32, i32, i32) {
    %c0_i32 = arith.constant 0 : i32
    %c0_i32_0 = arith.constant 0 : i32
    return %arg0, %c0_i32, %arg1 : i32, i32, i32
  }
}

</mosaic_0001>

<bundles_post_ra>
// kernel: tpu_custom_call.1
= control target key start
LH: loop header
LB: loop body
LE: loop exit
PB: predicated region body
PF: predicated region fallthrough
CT: control target
= control target key end

     0   :  { %8 = vsyncpa [#allocation5], 0  ;;  %s1473_s0 = inlined_call_operand.hbm [shape: f32[3], index: 0, kind: input, shape index: {}]   ;;  %s1474_s1 = inlined_call_operand.hbm [shape: f32[2,4,134], index: 1, kind: input, shape index: {}]   ;;  %s1475_s2 = inlined_call_operand.hbm [shape: f32[8,13], index: 2, kind: input, shape index: {}]   ;;  %s1476_s3 = inlined_call_operand.hbm [shape: f32[2,8,128], index: 3, kind: output, shape index: {}]  }
   0x1   :  { %9 = vsyncpa [#allocation3], 0 }
   0x2   :  { %11 = vsyncpa [#allocation3 + $0x1], 0 }
   0x3   :  { %12 = vsyncpa [#allocation8], 0 }
   0x4   :  { %13 = vsyncpa [#allocation4], 0 }
   0x5   :  { %15 = vsyncpa [#allocation4 + $0x1], 0  ;;  %s1127_s12 = smov 0   ;;  %s1129_s13 = smov 0  }
   0x6   :  { %s1131_s14 = smov 0   ;;  %s1133_s15 = smov 0  }
   0x7   :  { %s1135_s16 = smov 0   ;;  %s1137_s17 = smov 0  }
   0x8 LB: > { %s788_s18 = sadd.s32 4294967295, %s1082_s17   ;;  %s789_s19 = sadd.s32 4294967294, %s1082_s17   ;;  %s1082_s17 = sphi %s1137_s17, %s21_s17   ;;  %s1078_s16 = sphi %s1135_s16, %s1492_s16   ;;  %s1074_s15 = sphi %s1133_s15, %s1491_s15   ;;  %s1070_s14 = sphi %s1131_s14, %s1490_s14   ;;  %s1066_s13 = sphi %s1129_s13, %s1489_s13   ;;  %s1062_s12 = sphi %s1127_s12, %s1488_s12  }
   0x9   : > { %p74_p0 = scmp.ne.s32.totalorder %s1066_s13, %s1062_s12  ;;  %p1161_p1 = scmp.eq.s32.totalorder %s788_s18, 0 }
   0xa   : > { %p1165_p2 = scmp.eq.s32.totalorder %s788_s18, 1  ;;  %p127_p3 = scmp.eq.s32.totalorder %s789_s19, 1 }
   0xb   : > { %p1171_p4 = por %p1161_p1, %p74_p0  ;;  %p790_p5 = scmp.ge.s32.totalorder %s1082_s17, 1 }
   0xc   : > { %p1176_p6 = por %p127_p3, %p74_p0  ;;  %p134_p7 = scmp.lt.s32.totalorder %s1082_s17, 3 }
   0xd   : > { %s1084_s25 = smov [#allocation7]   ;;  %s33_s28 = sadd.s32 1, %s1078_s16 }
   0xe   : > { %s1480_s23 = scalar_select %p1176_p6, 1, 0 }
   0xf   : > { %p1181_p8 = pnand %p790_p5, %p134_p7  ;;  %s156_s26 = sshll.u32 %s1084_s25, 4  ;;  %s157_s26 = int_to_ptr.vmem [resolvable:$true] %s156_s26 }
  0x10   : > { %p1195_p12 = scmp.ge.s32.totalorder %s33_s28, 2  ;;  %s1085_s30 = smov [#allocation2]  }
  0x11   : > { %p825_p10 = pneg %p1181_p8  ;;  %s951_s6 = scalar_lea.vmem %s157_s26, 128 }
  0x12   : > { %p952_p0 = scmp.ne.s32.totalorder %s157_s26, %s951_s6  ;;  %p959_p7 = scmp.lt.s32.totalorder %s157_s26, %s157_s26 }
  0x13   : > { %p1190_p11 = pnand %p825_p10, %p1161_p1  ;;  %p960_p10 = scmp.lt.s32.totalorder %s951_s6, %s951_s6 }
  0x15   : > { %828 = dma.hbm_to_smem (!%p1190_p11), %s1473_s0, 16, %s1085_s30, [#allocation5]  }
  0x16   : > { %p942_p13 = pneg %p1190_p11  ;;  %p961_p9 = por %p960_p10, %p959_p7 }
  0x18   : > { %p954_p3 = pnand %p952_p0, %p942_p13 }
  0x1a   : > { %p955_p5 = pneg %p954_p3 }
  0x1c   : > { %p962_p6 = pnand %p961_p9, %p955_p5 }
  0x1e   : > { %965 = shalt.err (!%p962_p6)
}
  0x1f   : > { %831 = dma.hbm_to_vmem [thread:$0]  (!%p1190_p11), %s1475_s2, 128, %s157_s26, [#allocation8]  }
  0x20   : > { %s1494_s28 = smov (%p1195_p12, %s33_s28), 0  ;;  %s61_s9 = sadd.s32 1, %s1070_s14 }
  0x21   : > { %p68_p6 = scmp.ne.s32.totalorder %s1070_s14, %s1066_s13  ;;  %s58_s10 = ssub.s32 %s1078_s16, %s1494_s28 }
  0x22   : > { %p69_p9 = scmp.eq.s32.totalorder %s1082_s17, 0  ;;  %p59_p13 = scmp.eq.s32.totalorder %s58_s10, 0 }
  0x23   : > { %p1223_p0 = por %p1165_p2, %p68_p6  ;;  %p842_p5 = scmp.lt.s32.totalorder %s1082_s17, 2 }
  0x24   : > { %p70_p3 = por %p69_p9, %p68_p6  ;;  %s167_s19 = sand.u32 1, %s1070_s14  }
  0x25   : > { %s1229_s18 = scalar_select %p59_p13, %s1070_s14, %s61_s9  }
  0x26   : > { %s812_s25 = sshll.u32 %s1078_s16, 7  ;;  %s794_s26 = sshll.u32 %s167_s19, 3 }
  0x27   : > { %s177_s30 = scalar_lea.hbm %s1474_s1, %s812_s25  ;;  %s171_s4 = scalar_lea.vmem [#allocation6], %s794_s26 }
  0x28   : > { %s179_s5 = sshll.u32 %s171_s4, 4  ;;  %p1236_p11 = pnand %p842_p5, %p70_p3  ;;  %s180_s5 = int_to_ptr.vmem [resolvable:$true] %s179_s5 }
  0x29   : > { %s168_s21 = scalar_lea.sflag [#allocation3], %s167_s19  ;;  %s979_s7 = scalar_lea.vmem %s180_s5, 128 }
  0x2a   : > { %p968_p2 = pneg %p1236_p11  ;;  %p980_p12 = scmp.ne.s32.totalorder %s180_s5, %s979_s7 }
  0x2b   : > { %s1086_s8 = smov [#allocation6]  }
  0x2c   : > { %p982_p7 = pnand %p980_p12, %p968_p2  ;;  %s984_s9 = sshll.u32 %s1086_s8, 4  ;;  %s985_s9 = int_to_ptr.vmem [resolvable:$false] %s984_s9 }
  0x2d   : > { %s986_s10 = scalar_lea.vmem %s985_s9, 256  ;;  %p987_p6 = scmp.lt.s32.totalorder %s180_s5, %s985_s9 }
  0x2e   : > { %p983_p10 = pneg %p982_p7  ;;  %p988_p9 = scmp.lt.s32.totalorder %s986_s10, %s979_s7 }
  0x30   : > { %p989_p13 = por %p988_p9, %p987_p6 }
  0x32   : > { %p990_p3 = pnand %p989_p13, %p983_p10 }
  0x34   : > { %993 = shalt.err (!%p990_p3)
}
  0x35   : > { %835 = dma.hbm_to_vmem [thread:$0]  (!%p1236_p11), %s177_s30, 128, %s180_s5, %s168_s21  }
  0x36   : > { %188 = sbr.rel (%p1181_p8) target bundleno = 533 (0x215), region = 32 }
  0x3b   : > { %1045 = dma.done.wait (%p1161_p1), [#allocation5], 16  }
  0x3c   : > { %1047 = vsyncadd (%p1161_p1), [#allocation5], 4294967280  ;;  %s1251_s19 = sand.u32 1, %s1066_s13  }
  0x3d   : > { %s799_s25 = sshll.u32 %s1251_s19, 3  ;;  %s195_s26 = scalar_lea.sflag [#allocation3], %s1251_s19 }
  0x3e   : > { %s1257_s27 = scalar_lea.vmem [#allocation6], %s799_s25 }
  0x3f   : > { %1049 = dma.done.wait (%p1171_p4), %s195_s26, 128  }
  0x40   : > { %1051 = vsyncadd (%p1171_p4), %s195_s26, 4294967168 }
  0x41   : > { %1053 = dma.done.wait (%p1161_p1), [#allocation8], 128  }
  0x42   : > { %1055 = vsyncadd (%p1161_p1), [#allocation8], 4294967168 }
  0x43   : > { %207 = sfence }
  0x44   : > { %v226_v0 = vld [vmem:[#allocation7] sm:$0xff]  ;;  %v1087_v1 = vmov 0   ;;  %v1088_v2 = vmov 2   ;;  %v1089_v3 = vmov 1   ;;  %v1090_v4 = vmov 3   ;;  %s1100_s20 = smov 1  }
  0x45   : > { %915 = vset.pattern.permute.xlu0 %v1087_v1  ;;  %917 = vset.pattern.permute.xlu1 %v1088_v2  ;;  %v1091_v5 = vmov 8   ;;  %v1092_v6 = vmov 9   ;;  %v1093_v7 = vmov 10   ;;  %v1094_v8 = vmov 4   ;;  %v230_v18 = vld [vmem:[%s1257_s27] sm:$0x11] }
  0x46   : > { %348 = vperm.xlu0 %915, %v226_v0   ;;  %383 = vperm.xlu1 %917, %v226_v0   ;;  %v1095_v9 = vmov 11   ;;  %v1096_v10 = vmov 6   ;;  %v1097_v11 = vmov 12   ;;  %v1098_v12 = vmov 5   ;;  %v263_v21 = vld [vmem:[%s1257_s27 + $0x1] sm:$0x11] }
  0x47   : > { %v1099_v13 = vmov 7   ;;  %v237_v14 = vlaneseq  ;;  %v291_v31 = vld [vmem:[%s1257_s27 + $0x2] sm:$0x11]  ;;  %s1101_s22 = smov 2   ;;  %v804_v42 = vld [vmem:[%s1257_s27] ss:$0 sm:$0xff] }
  0x48   : > { %v319_v45 = vld [vmem:[%s1257_s27 + $0x3] sm:$0x11]  ;;  %s1102_s24 = smov 3   ;;  %v805_v58 = vld [vmem:[%s1257_s27 + $0x1] ss:$0 sm:$0xff]  ;;  %s1103_s29 = smov 127  }
  0x49   : > { %v238_v15 = vshrl.u32 %v237_v14, 7  ;;  %s1104_s30 = smov 126   ;;  %s1105_s4 = smov 125   ;;  %vm359_vm0 = vcmask 7168   ;;  %vm494_vm1 = vcmask 15360   ;;  %vm428_vm2 = vcmask 1039360  }
  0x4a   : > { %916 = vset.pattern.permute.xlu0 %v1089_v3  ;;  %918 = vset.pattern.permute.xlu1 %v1090_v4  ;;  %vm531_vm3 = vcmask 1031168   ;;  %s1393_s5 = sld [smem:[#allocation2]]  ;;  %vm623_vm4 = vcmask 1022976   ;;  %s809_s7 = sshll.u32 %s1074_s15, 7 }
  0x4b   : > { %366 = vperm.xlu0 %916, %v226_v0   ;;  %400 = vperm.xlu1 %918, %v226_v0   ;;  %v239_v16 = vsub.s32 0, %v238_v15  ;;  %v243_v17 = vsub.s32 4, %v238_v15  ;;  %s1399_s6 = sld [smem:[#allocation2 + $0x1]]  ;;  %s225_s8 = scalar_lea.vmem [#allocation9], %s799_s25 }
  0x4c   : > { %s803_s21 = sld [smem:[#allocation2 + $0x2]]  ;;  %s687_s9 = sshll.u32 %s225_s8, 4  ;;  %s688_s9 = int_to_ptr.vmem [resolvable:$true] %s687_s9 }
  0x4d   : > { %v240_v19 = vrot.slane %v230_v18, %v239_v16  ;;  %v244_v20 = vrot.slane %v230_v18, %v243_v17  ;;  %v272_v24 = vrot.slane %v263_v21, %v239_v16  ;;  %v276_v25 = vrot.slane %v263_v21, %v243_v17  ;;  %s1106_s15 = smov [#allocation9]  }
  0x4e   : > { %v300_v36 = vrot.slane %v291_v31, %v239_v16  ;;  %v304_v40 = vrot.slane %v291_v31, %v243_v17  ;;  %v328_v51 = vrot.slane %v319_v45, %v239_v16  ;;  %v332_v52 = vrot.slane %v319_v45, %v243_v17  ;;  %s998_s25 = sshll.u32 %s1106_s15, 4  ;;  %s999_s25 = int_to_ptr.vmem [resolvable:$false] %s998_s25 }
  0x4f   : > { %919 = vset.pattern.permute.xlu1 %v1091_v5  ;;  %920 = vset.pattern.permute.xlu0 %v1092_v6  ;;  %v1269_v22 = vrot.slane %v240_v19, %v239_v16  ;;  %v1271_v23 = vrot.slane %v244_v20, %v239_v16  ;;  %v1277_v29 = vrot.slane %v272_v24, %v239_v16  ;;  %v807_v19 = vld [vmem:[%s1257_s27 + $0x3] ss:$0 sm:$0xff]  ;;  %p1001_p5 = scmp.lt.s32.totalorder %s688_s9, %s999_s25 }
  0x50   : > { %417 = vperm.xlu1 %919, %v226_v0   ;;  %435 = vperm.xlu0 %920, %v226_v0   ;;  %v1279_v30 = vrot.slane %v276_v25, %v239_v16  ;;  %v1292_v38 = vrot.slane %v300_v36, %v239_v16  ;;  %v1304_v49 = vrot.slane %v304_v40, %v239_v16 }
  0x51   : > { %v338_v59 = vrot.slane %v328_v51, %v239_v16  ;;  %v342_v60 = vrot.slane %v332_v52, %v239_v16 }
  0x54   : > { %921 = vset.pattern.permute.xlu1 %v1093_v7  ;;  %923 = vset.pattern.permute.xlu0 %v1094_v8  ;;  %v806_v8 = vld [vmem:[%s1257_s27 + $0x2] ss:$0 sm:$0xff]  ;;  %s1430_s27 = scalar_lea.hbm %s1476_s3, %s809_s7 }
  0x55   : > { %452 = vperm.xlu1 %921, %v226_v0   ;;  %233 = vperm.xlu0 %923, %v226_v0  }
  0x59   : > { %922 = vset.pattern.permute.xlu1 %v1095_v9  ;;  %926 = vset.pattern.permute.xlu0 %v1096_v10 }
  0x5a   : > { %469 = vperm.xlu1 %922, %v226_v0   ;;  %293 = vperm.xlu0 %926, %v226_v0  }
  0x5e   : > { %924 = vset.pattern.permute.xlu1 %v1097_v11  ;;  %928 = vset.pattern.permute.xlu0 %v1095_v9 }
  0x5f   : > { %258 = vperm.xlu1 %924, %v226_v0  }
  0x63   : > { %925 = vset.pattern.permute.xlu1 %v1098_v12 }
  0x64   : > { %265 = vperm.xlu1 %925, %v226_v0  }
  0x68   : > { %927 = vset.pattern.permute.xlu1 %v1099_v13 }
  0x69   : > { %321 = vperm.xlu1 %927, %v226_v0  }
  0xc1   : > { %v349_v26 = vpop.permute.xlu0 %348  ;;  %v1282_v33 = vpop.permute.xlu1 %383 }
  0xc2   : > { %v351_v27 = vmul.f32 %v349_v26, %v1269_v22  ;;  %v352_v28 = vmul.f32 %v349_v26, %v1271_v23  ;;  %v386_v43 = vmul.f32 %v1282_v33, %v1292_v38  ;;  %v576_v48 = vmul.f32 %v804_v42, %v349_v26 }
  0xc3   : > { %v387_v54 = vmul.f32 %v1282_v33, %v1304_v49  ;;  %v600_v15 = vmul.f32 %v806_v8, %v1282_v33 }
  0xc4   : > { %357 = vrot.lane.b32.xlu0 %v352_v28, %s1100_s20  ;;  %355 = vrot.lane.b32.xlu1 %v351_v27, %s1100_s20 }
  0xc6   : > { %v367_v32 = vpop.permute.xlu0 %366  ;;  %v1288_v37 = vpop.permute.xlu1 %400 }
  0xc7   : > { %v369_v34 = vmul.f32 %v367_v32, %v1277_v29  ;;  %v370_v35 = vmul.f32 %v367_v32, %v1279_v30  ;;  %v588_v61 = vmul.f32 %v805_v58, %v367_v32  ;;  %v403_v1 = vmul.f32 %v1288_v37, %v338_v59 }
  0xc8   : > { %492 = vrot.lane.b32.xlu0 %v352_v28, %s1101_s22  ;;  %490 = vrot.lane.b32.xlu1 %v351_v27, %s1101_s22  ;;  %v404_v2 = vmul.f32 %v1288_v37, %v342_v60  ;;  %v612_v20 = vmul.f32 %v807_v19, %v1288_v37 }
  0xcb   : > { %v1294_v39 = vpop.permute.xlu0 %435  ;;  %v418_v41 = vpop.permute.xlu1 %417 }
  0xcc   : > { %375 = vrot.lane.b32.xlu0 %v370_v35, %s1100_s20  ;;  %373 = vrot.lane.b32.xlu1 %v369_v34, %s1100_s20  ;;  %v420_v9 = vmul.f32 %v418_v41, %v1269_v22  ;;  %v421_v18 = vmul.f32 %v418_v41, %v1271_v23  ;;  %v438_v21 = vmul.f32 %v1294_v39, %v1277_v29 }
  0xd0   : > { %502 = vrot.lane.b32.xlu0 %v370_v35, %s1101_s22  ;;  %500 = vrot.lane.b32.xlu1 %v369_v34, %s1101_s22  ;;  %v234_v44 = vpop.permute.xlu0 %233  ;;  %v1306_v50 = vpop.permute.xlu1 %452 }
  0xd1   : > { %v255_v46 = vmul.f32 %v1269_v22, %v234_v44  ;;  %v256_v47 = vmul.f32 %v1271_v23, %v234_v44  ;;  %v439_v22 = vmul.f32 %v1294_v39, %v1279_v30  ;;  %v455_v23 = vmul.f32 %v1306_v50, %v1292_v38 }
  0xd2   : > { %v456_v24 = vmul.f32 %v1306_v50, %v1304_v49 }
  0xd4   : > { %390 = vrot.lane.b32.xlu0 %v386_v43, %s1100_s20  ;;  %578 = vrot.lane.b32.xlu1 %v576_v48, %s1102_s24 }
  0xd5   : > { %v294_v53 = vpop.permute.xlu0 %293  ;;  %v1312_v55 = vpop.permute.xlu1 %469 }
  0xd6   : > { %v315_v56 = vmul.f32 %v1292_v38, %v294_v53  ;;  %v316_v57 = vmul.f32 %v1304_v49, %v294_v53  ;;  %v472_v25 = vmul.f32 %v1312_v55, %v338_v59  ;;  %v473_v26 = vmul.f32 %v1312_v55, %v342_v60 }
  0xd8   : > { %509 = vrot.lane.b32.xlu0 %v386_v43, %s1101_s22  ;;  %392 = vrot.lane.b32.xlu1 %v387_v54, %s1100_s20 }
  0xda   : > { %v259_v62 = vpop.permute.xlu1 %258 }
  0xdb   : > { %v261_v63 = vadd.f32 %v259_v62, %v255_v46  ;;  %v262_v0 = vadd.f32 %v259_v62, %v256_v47 }
  0xdc   : > { %590 = vrot.lane.b32.xlu0 %v588_v61, %s1102_s24  ;;  %511 = vrot.lane.b32.xlu1 %v387_v54, %s1101_s22 }
  0xdf   : > { %v266_v3 = vpop.permute.xlu1 %265 }
  0xe0   : > { %409 = vrot.lane.b32.xlu0 %v404_v2, %s1100_s20  ;;  %407 = vrot.lane.b32.xlu1 %v403_v1, %s1100_s20  ;;  %v287_v4 = vmul.f32 %v1277_v29, %v266_v3  ;;  %v288_v5 = vmul.f32 %v1279_v30, %v266_v3  ;;  %s673_s20 = scalar_lea.sflag [#allocation4], %s1251_s19 }
  0xe2   : > { %v289_v6 = vadd.f32 %v287_v4, %v261_v63  ;;  %v290_v7 = vadd.f32 %v288_v5, %v262_v0 }
  0xe4   : > { %520 = vrot.lane.b32.xlu0 %v404_v2, %s1101_s22  ;;  %518 = vrot.lane.b32.xlu1 %v403_v1, %s1101_s22  ;;  %v317_v10 = vadd.f32 %v315_v56, %v289_v6  ;;  %v318_v11 = vadd.f32 %v316_v57, %v290_v7  ;;  %v322_v12 = vpop.permute.xlu1 %321  ;;  %s994_s22 = scalar_lea.vmem %s688_s9, 128 }
  0xe5   : > { %v343_v13 = vmul.f32 %v338_v59, %v322_v12  ;;  %v344_v14 = vmul.f32 %v342_v60, %v322_v12  ;;  %p995_p1 = scmp.ne.s32.totalorder %s688_s9, %s994_s22 }
  0xe7   : > { %v1332_v16 = vadd.f32 %v343_v13, %v317_v10  ;;  %v1334_v17 = vadd.f32 %v344_v14, %v318_v11  ;;  %p996_p4 = pnand %p995_p1, %p1223_p0 }
  0xe8   : > { %424 = vrot.lane.b32.xlu0 %v420_v9, %s1103_s29  ;;  %602 = vrot.lane.b32.xlu1 %v600_v15, %s1102_s24 }
  0xe9   : > { %p997_p8 = pneg %p996_p4 }
  0xec   : > { %527 = vrot.lane.b32.xlu0 %v420_v9, %s1104_s30  ;;  %426 = vrot.lane.b32.xlu1 %v421_v18, %s1103_s29 }
  0xf0   : > { %614 = vrot.lane.b32.xlu0 %v612_v20, %s1102_s24  ;;  %529 = vrot.lane.b32.xlu1 %v421_v18, %s1104_s30  ;;  %s1000_s24 = scalar_lea.vmem %s999_s25, 256 }
  0xf1   : > { %p1002_p11 = scmp.lt.s32.totalorder %s1000_s24, %s994_s22 }
  0xf3   : > { %p1003_p2 = por %p1002_p11, %p1001_p5 }
  0xf4   : > { %444 = vrot.lane.b32.xlu0 %v439_v22, %s1103_s29  ;;  %442 = vrot.lane.b32.xlu1 %v438_v21, %s1103_s29 }
  0xf5   : > { %p1004_p12 = pnand %p1003_p2, %p997_p8 }
  0xf8   : > { %539 = vrot.lane.b32.xlu0 %v439_v22, %s1104_s30  ;;  %537 = vrot.lane.b32.xlu1 %v438_v21, %s1104_s30 }
  0xfc   : > { %621 = vrot.lane.b32.xlu0 %v421_v18, %s1105_s4  ;;  %619 = vrot.lane.b32.xlu1 %v420_v9, %s1105_s4 }
 0x100   : > { %461 = vrot.lane.b32.xlu0 %v456_v24, %s1103_s29  ;;  %459 = vrot.lane.b32.xlu1 %v455_v23, %s1103_s29 }
 0x104   : > { %548 = vrot.lane.b32.xlu0 %v456_v24, %s1104_s30  ;;  %546 = vrot.lane.b32.xlu1 %v455_v23, %s1104_s30 }
 0x108   : > { %631 = vrot.lane.b32.xlu0 %v439_v22, %s1105_s4  ;;  %629 = vrot.lane.b32.xlu1 %v438_v21, %s1105_s4 }
 0x10c   : > { %478 = vrot.lane.b32.xlu0 %v473_v26, %s1103_s29  ;;  %476 = vrot.lane.b32.xlu1 %v472_v25, %s1103_s29 }
 0x110   : > { %557 = vrot.lane.b32.xlu0 %v473_v26, %s1104_s30  ;;  %555 = vrot.lane.b32.xlu1 %v472_v25, %s1104_s30 }
 0x114   : > { %640 = vrot.lane.b32.xlu0 %v456_v24, %s1105_s4  ;;  %638 = vrot.lane.b32.xlu1 %v455_v23, %s1105_s4 }
 0x118   : > { %649 = vrot.lane.b32.xlu0 %v473_v26, %s1105_s4  ;;  %647 = vrot.lane.b32.xlu1 %v472_v25, %s1105_s4 }
 0x136   : > { %v356_v27 = vpop.permute.xlu1 %355  ;;  %v358_v28 = vpop.permute.xlu0 %357 }
 0x137   : > { %v363_v29 = vadd.f32 %v356_v27, %v1332_v16  ;;  %v360_v30 = vsel %vm359_vm0, %v356_v27, %v358_v28 }
 0x138   : > { %v364_v31 = vadd.f32 %v360_v30, %v1334_v17 }
 0x13a   : > { %v491_v32 = vpop.permute.xlu1 %490  ;;  %v493_v33 = vpop.permute.xlu0 %492 }
 0x13b   : > { %v498_v34 = vadd.f32 %v491_v32, %v1332_v16  ;;  %v495_v62 = vsel %vm494_vm1, %v491_v32, %v493_v33 }
 0x13c   : > { %v499_v6 = vadd.f32 %v495_v62, %v1334_v17 }
 0x13e   : > { %v374_v35 = vpop.permute.xlu1 %373  ;;  %v376_v36 = vpop.permute.xlu0 %375 }
 0x13f   : > { %v377_v61 = vsel %vm359_vm0, %v374_v35, %v376_v36  ;;  %v380_v3 = vadd.f32 %v374_v35, %v363_v29 }
 0x140   : > { %v381_v2 = vadd.f32 %v377_v61, %v364_v31 }
 0x142   : > { %v501_v37 = vpop.permute.xlu1 %500  ;;  %v503_v38 = vpop.permute.xlu0 %502 }
 0x143   : > { %v504_v4 = vsel %vm494_vm1, %v501_v37, %v503_v38  ;;  %v507_v15 = vadd.f32 %v501_v37, %v498_v34 }
 0x144   : > { %v508_v12 = vadd.f32 %v504_v4, %v499_v6 }
 0x146   : > { %v1371_v39 = vpop.permute.xlu1 %578  ;;  %v391_v40 = vpop.permute.xlu0 %390 }
 0x147   : > { %v397_v8 = vadd.f32 %v391_v40, %v380_v3  ;;  %v582_v31 = vadd.f32 %v1371_v39, %v1334_v17  ;;  %v581_v37 = vadd.f32 %v1371_v39, %v1332_v16 }
 0x14a   : > { %v393_v41 = vpop.permute.xlu1 %392  ;;  %v510_v42 = vpop.permute.xlu0 %509 }
 0x14b   : > { %v394_v63 = vsel %vm359_vm0, %v391_v40, %v393_v41  ;;  %v516_v23 = vadd.f32 %v510_v42, %v507_v15 }
 0x14c   : > { %v398_v7 = vadd.f32 %v394_v63, %v381_v2  ;;  %v566_v2 = vstv %s1399_s6 }
 0x14e   : > { %v512_v43 = vpop.permute.xlu1 %511  ;;  %v1373_v44 = vpop.permute.xlu0 %590 }
 0x14f   : > { %v513_v9 = vsel %vm494_vm1, %v510_v42, %v512_v43  ;;  %v594_v38 = vadd.f32 %v1373_v44, %v582_v31 }
 0x150   : > { %v517_v20 = vadd.f32 %v513_v9, %v508_v12 }
 0x152   : > { %v408_v45 = vpop.permute.xlu1 %407  ;;  %v410_v46 = vpop.permute.xlu0 %409 }
 0x153   : > { %v411_v5 = vsel %vm359_vm0, %v408_v45, %v410_v46  ;;  %v414_v18 = vadd.f32 %v408_v45, %v397_v8 }
 0x154   : > { %v415_v13 = vadd.f32 %v411_v5, %v398_v7 }
 0x156   : > { %v519_v47 = vpop.permute.xlu1 %518  ;;  %v521_v48 = vpop.permute.xlu0 %520 }
 0x157   : > { %v522_v19 = vsel %vm494_vm1, %v519_v47, %v521_v48  ;;  %v525_v32 = vadd.f32 %v519_v47, %v516_v23  ;;  %v593_v48 = vadd.f32 %v1373_v44, %v581_v37 }
 0x158   : > { %v526_v27 = vadd.f32 %v522_v19, %v517_v20 }
 0x15a   : > { %v1375_v49 = vpop.permute.xlu1 %602  ;;  %v425_v50 = vpop.permute.xlu0 %424 }
 0x15e   : > { %v427_v51 = vpop.permute.xlu1 %426  ;;  %v528_v52 = vpop.permute.xlu0 %527 }
 0x15f   : > { %v429_v14 = vsel %vm428_vm2, %v425_v50, %v427_v51  ;;  %v433_v21 = vadd.f32 %v427_v51, %v415_v13  ;;  %v606_v50 = vadd.f32 %v1375_v49, %v594_v38 }
 0x160   : > { %v432_v24 = vadd.f32 %v429_v14, %v414_v18 }
 0x162   : > { %v530_v53 = vpop.permute.xlu1 %529  ;;  %v1377_v54 = vpop.permute.xlu0 %614 }
 0x163   : > { %v532_v28 = vsel %vm531_vm3, %v528_v52, %v530_v53  ;;  %v536_v34 = vadd.f32 %v530_v53, %v526_v27  ;;  %v605_v52 = vadd.f32 %v1375_v49, %v593_v48  ;;  %v618_v53 = vadd.f32 %v1377_v54, %v606_v50 }
 0x164   : > { %v535_v40 = vadd.f32 %v532_v28, %v525_v32 }
 0x166   : > { %v443_v55 = vpop.permute.xlu1 %442  ;;  %v445_v56 = vpop.permute.xlu0 %444 }
 0x167   : > { %v446_v22 = vsel %vm428_vm2, %v443_v55, %v445_v56  ;;  %v450_v29 = vadd.f32 %v445_v56, %v433_v21  ;;  %v487_v56 = vstv %s1393_s5 }
 0x168   : > { %v449_v33 = vadd.f32 %v446_v22, %v432_v24  ;;  %v658_v24 = vstv %s803_s21 }
 0x16a   : > { %v538_v57 = vpop.permute.xlu1 %537  ;;  %v540_v58 = vpop.permute.xlu0 %539 }
 0x16b   : > { %v541_v35 = vsel %vm531_vm3, %v538_v57, %v540_v58  ;;  %v545_v17 = vadd.f32 %v540_v58, %v536_v34 }
 0x16c   : > { %v544_v51 = vadd.f32 %v541_v35, %v535_v40 }
 0x16e   : > { %v1379_v59 = vpop.permute.xlu1 %619  ;;  %v1381_v60 = vpop.permute.xlu0 %621 }
 0x16f   : > { %v624_v61 = vsel %vm623_vm4, %v1379_v59, %v1381_v60  ;;  %v628_v49 = vadd.f32 %v1381_v60, %v618_v53 }
 0x172   : > { %v460_v0 = vpop.permute.xlu1 %459  ;;  %v462_v1 = vpop.permute.xlu0 %461 }
 0x173   : > { %v463_v30 = vsel %vm428_vm2, %v460_v0, %v462_v1  ;;  %v467_v36 = vadd.f32 %v462_v1, %v450_v29  ;;  %v617_v0 = vadd.f32 %v1377_v54, %v605_v52 }
 0x174   : > { %v466_v41 = vadd.f32 %v463_v30, %v449_v33 }
 0x175   : > { %v627_v6 = vadd.f32 %v624_v61, %v617_v0 }
 0x176   : > { %v547_v10 = vpop.permute.xlu1 %546  ;;  %v549_v11 = vpop.permute.xlu0 %548 }
 0x177   : > { %v550_v45 = vsel %vm531_vm3, %v547_v10, %v549_v11  ;;  %v554_v39 = vadd.f32 %v549_v11, %v545_v17 }
 0x178   : > { %v553_v55 = vadd.f32 %v550_v45, %v544_v51 }
 0x17a   : > { %v630_v25 = vpop.permute.xlu1 %629  ;;  %v632_v26 = vpop.permute.xlu0 %631 }
 0x17b   : > { %v633_v4 = vsel %vm623_vm4, %v630_v25, %v632_v26  ;;  %v637_v59 = vadd.f32 %v632_v26, %v628_v49 }
 0x17c   : > { %v636_v13 = vadd.f32 %v633_v4, %v627_v6 }
 0x17e   : > { %v477_v42 = vpop.permute.xlu1 %476  ;;  %v479_v43 = vpop.permute.xlu0 %478 }
 0x17f   : > { %v480_v46 = vsel %vm428_vm2, %v477_v42, %v479_v43  ;;  %v484_v47 = vadd.f32 %v479_v43, %v467_v36 }
 0x180   : > { %v483_v16 = vadd.f32 %v480_v46, %v466_v41 }
 0x181   : > { %v486_v62 = vmax.f32 %v484_v47, 0.0 }
 0x182   : > { %v556_v57 = vpop.permute.xlu1 %555  ;;  %v558_v58 = vpop.permute.xlu0 %557  ;;  %v485_v1 = vmax.f32 %v483_v16, 0.0 }
 0x183   : > { %v559_v44 = vsel %vm531_vm3, %v556_v57, %v558_v58  ;;  %v563_v63 = vadd.f32 %v558_v58, %v554_v39  ;;  %v489_v10 = vmul.f32 %v487_v56, %v486_v62 }
 0x184   : > { %v562_v3 = vadd.f32 %v559_v44, %v553_v55  ;;  %v488_v54 = vmul.f32 %v487_v56, %v485_v1 }
 0x185   : > { %v565_v5 = vmax.f32 %v563_v63, 0.0 }
 0x186   : > { %v564_v7 = vmax.f32 %v562_v3, 0.0  ;;  %v639_v8 = vpop.permute.xlu1 %638  ;;  %v641_v9 = vpop.permute.xlu0 %640 }
 0x187   : > { %v568_v11 = vmul.f32 %v566_v2, %v565_v5  ;;  %v642_v12 = vsel %vm623_vm4, %v639_v8, %v641_v9  ;;  %v646_v15 = vadd.f32 %v641_v9, %v637_v59 }
 0x188   : > { %v567_v14 = vmul.f32 %v566_v2, %v564_v7  ;;  %v645_v19 = vadd.f32 %v642_v12, %v636_v13 }
 0x189   : > { %v570_v18 = vadd.f32 %v568_v11, %v489_v10 }
 0x18a   : > { %v648_v60 = vpop.permute.xlu1 %647  ;;  %v650_v20 = vpop.permute.xlu0 %649  ;;  %v569_v21 = vadd.f32 %v567_v14, %v488_v54 }
 0x18b   : > { %v651_v22 = vsel %vm623_vm4, %v648_v60, %v650_v20  ;;  %v655_v23 = vadd.f32 %v650_v20, %v646_v15 }
 0x18c   : > { %v654_v25 = vadd.f32 %v651_v22, %v645_v19 }
 0x18d   : > { %v657_v26 = vmax.f32 %v655_v23, 0.0 }
 0x18e   : > { %v656_v27 = vmax.f32 %v654_v25, 0.0 }
 0x18f   : > { %v660_v28 = vmul.f32 %v658_v24, %v657_v26 }
 0x190   : > { %v659_v29 = vmul.f32 %v658_v24, %v656_v27 }
 0x191   : > { %v662_v30 = vadd.f32 %v660_v28, %v570_v18 }
 0x192   : > { %v661_v31 = vadd.f32 %v659_v29, %v569_v21 }
 0x193   : > { %667 = vrot.lane.b32.xlu0 %v662_v30, %s1105_s4 }
 0x194   : > { %665 = vrot.lane.b32.xlu1 %v661_v31, %s1105_s4 }
 0x205   : > { %v668_v32 = vpop.permute.xlu0 %667 }
 0x206   : > { %v666_v33 = vpop.permute.xlu1 %665 }
 0x207   : > { %v669_v34 = vsel %vm623_vm4, %v666_v33, %v668_v32 }
 0x208   : > { %671 = vst [vmem:[%s225_s8] sm:$0xff] %v669_v34 }
 0x209   : > { %1007 = shalt.err (!%p1004_p12)
}
 0x20a   : > { %s1008_s29 = scalar_lea.hbm %s1430_s27, 128  ;;  %s1012_s4 = scalar_lea.hbm %s1476_s3, 256 }
 0x20b   : > { %p1009_p7 = scmp.ne.s32.totalorder %s1430_s27, %s1008_s29  ;;  %p1013_p9 = scmp.lt.s32.totalorder %s1430_s27, %s1476_s3 }
 0x20c   : > { %p1014_p13 = scmp.lt.s32.totalorder %s1012_s4, %s1008_s29 }
 0x20d   : > { %p1010_p10 = pnand %p1009_p7, %p1223_p0 }
 0x20e   : > { %p1015_p3 = por %p1014_p13, %p1013_p9 }
 0x20f   : > { %p1011_p6 = pneg %p1010_p10 }
 0x211   : > { %p1016_p1 = pnand %p1015_p3, %p1011_p6 }
 0x213   : > { %1019 = shalt.err (!%p1016_p1)
}
 0x214   : > { %823 = dma.vmem_to_hbm [thread:$0]  (%p1223_p0), %s688_s9, 128, %s1430_s27, %s673_s20  }
 0x215 PF: > { %s699_s21 = sand.u32 1, %s1062_s12   ;;  %p1486_p4 = scmp.ne.s32.totalorder %s1480_s23, 0 }
 0x216   : > { %p1487_p8 = scmp.ge.s32.totalorder %s1082_s17, 2  ;;  %s700_s7 = scalar_lea.sflag [#allocation4], %s699_s21 }
 0x218   : > { %p837_p5 = pnand %p1487_p8, %p1486_p4 }
 0x21a   : > { %p838_p11 = pneg %p837_p5 }
 0x21c   : > { %1057 = dma.done.wait (%p838_p11), %s700_s7, 128  }
 0x21d   : > { %1059 = vsyncadd (%p838_p11), %s700_s7, 4294967168  ;;  %s21_s17 = sadd.s32 1, %s1082_s17   ;;  %s1488_s12 = smov %s1066_s13 }
 0x21e   : > { %p18_p2 = scmp.ge.s32.totalorder %s21_s17, 4   ;;  %s1489_s13 = smov %s1070_s14 }
 0x21f   : > { %s1490_s14 = smov %s1229_s18  ;;  %s1491_s15 = smov %s1078_s16 }
 0x220   : > { %s1492_s16 = smov %s1494_s28  ;;  %20 = sbr.rel (!%p18_p2) target bundleno = 8 (0x8), region = 86 }
 0x225   :  { %705 = vsyncpa [#allocation3], 1 }
 0x226   :  { %707 = vsyncpa [#allocation3 + $0x1], 1 }
 0x227   :  { %708 = vsyncpa [#allocation8], 1 }
 0x228   :  { %709 = vsyncpa [#allocation4], 1 }
 0x229   :  { %711 = vsyncpa [#allocation4 + $0x1], 1 }
 0x22a   :  { %712 = vsyncpa [#allocation5], 1 }
 0x22b   :  { %714 = vsyncpa [#allocation5 + $0x1], 1 }

</bundles_post_ra>
